<compile_context>
chip_gen: v7x
topology: tpu7x:2x2x1
jax: 0.10.0
libtpu: 0.0.40
codegen_flags: <defaults>
</compile_context>

<pallas_src>
import jax
import jax.numpy as jnp
from jax.experimental import pallas as pl
from jax.experimental.pallas import tpu as pltpu


def _round_up(x, m):
    return ((x + m - 1) // m) * m


def _choose_tiling(A, *, max_tn=1664):
    """Pick (TN, num_tiles, A_pad): TN multiple of 128, A_pad = TN*num_tiles.

    Cost model: padded columns DMA'd for nothing + ~64 columns-equivalent of
    per-grid-step overhead (0.35us step vs ~6 KB/column of w2 at H4=3072).
    This naturally prefers fewer, bigger tiles (and an even tile count at the
    real SOHO shape: 2 x 1664 for A=3129) without over-padding.
    """
    max_tn = max(128, _round_up(max_tn, 128))
    max_nt = max(1, -(-A // 128))
    best = None
    for nt in range(1, max_nt + 1):
        tn = _round_up(-(-A // nt), 128)
        if tn > max_tn:
            continue
        a_pad = tn * nt
        cost = a_pad + 64 * nt
        if best is None or cost < best[0]:
            best = (cost, tn, nt, a_pad)
    if best is None:                       # A too wide for max_tn in one tile
        tn = max_tn
        nt = -(-_round_up(A, 128) // tn)
        return tn, nt, tn * nt
    return best[1], best[2], best[3]


def _vqa_head_kernel(x_ref, w1_ref, b1_ref, w2_ref, b2_ref, o_ref):
    # x_ref : (B_pad, H)     bf16   resident
    # w1_ref: (H, H4)        bf16   resident
    # b1_ref: (1, H4)        f32    resident
    # w2_ref: (H4, TN)       bf16   streamed column tile
    # b2_ref: (1, A_pad)     f32    resident (sliced per tile)
    # o_ref : (B_pad, TN)    f32
    i = pl.program_id(0)
    tn = w2_ref.shape[1]

    h = jnp.dot(x_ref[...], w1_ref[...], preferred_element_type=jnp.float32)
    h = jnp.maximum(h + b1_ref[...], 0.0)          # Linear1 + ReLU
    # Dropout(0.5) is identity at inference time (eval mode); no-op here.

    col0 = pl.multiple_of(i * tn, 128)
    b2_tile = b2_ref[:, pl.ds(col0, tn)]
    out = jnp.dot(h.astype(w2_ref.dtype), w2_ref[...],
                  preferred_element_type=jnp.float32) + b2_tile
    o_ref[...] = out.astype(o_ref.dtype)


def prepare_vqa_head_params(w1, b1, w2, b2, *, max_tn=1664):
    """One-time prep: cast weights to bf16 and pad the answer dim.

    Do this once at load time (outside the per-step forward) so the forward's
    HBM traffic is only the kernel's own weight stream.
    """
    H, H4 = w1.shape
    A = w2.shape[1]
    TN, num_tiles, A_pad = _choose_tiling(A, max_tn=max_tn)

    w1b = w1.astype(jnp.bfloat16)
    b1f = jnp.asarray(b1, jnp.float32).reshape(1, H4)
    w2p = jnp.zeros((H4, A_pad), jnp.bfloat16).at[:, :A].set(
        w2.astype(jnp.bfloat16))
    b2p = jnp.zeros((1, A_pad), jnp.float32).at[:, :A].set(
        jnp.asarray(b2, jnp.float32).reshape(1, A))

    return {
        "w1": w1b, "b1": b1f, "w2": w2p, "b2": b2p,
        "H": H, "H4": H4, "A": A,
        "TN": TN, "A_pad": A_pad, "num_tiles": num_tiles,
    }


def soho_vqa_head_forward(fusion_feature, params):
    """fusion_feature: (B, S, H) float32.  Returns (B, num_answers) float32."""
    cls = fusion_feature[:, 0, :]                 # glue: CLS-token slice
    B, H = cls.shape
    H4 = params["H4"]
    A = params["A"]
    TN = params["TN"]
    A_pad = params["A_pad"]
    num_tiles = params["num_tiles"]
    w1b, b1f, w2p, b2p = params["w1"], params["b1"], params["w2"], params["b2"]

    # Activation prep (tiny: B x H) — kept per call.
    B_pad = _round_up(B, 16)                      # bf16 sublane-dense rows
    x = jnp.zeros((B_pad, H), jnp.bfloat16).at[:B].set(cls.astype(jnp.bfloat16))

    # Cost hint for the XLA scheduler (memory-bound custom call).
    flops = 2 * B_pad * H * H4 * num_tiles + 2 * B_pad * H4 * A_pad
    bytes_accessed = (B_pad * H * 2 + H * H4 * 2 + H4 * 4
                      + H4 * A_pad * 2 + A_pad * 4 + B_pad * A_pad * 4)
    cost = pl.CostEstimate(flops=flops, transcendentals=0,
                           bytes_accessed=bytes_accessed)

    resident = dict(pipeline_mode=pl.Buffered(1))   # constant index_map inputs

    out = pl.pallas_call(
        _vqa_head_kernel,
        out_shape=jax.ShapeDtypeStruct((B_pad, A_pad), jnp.float32),
        grid_spec=pltpu.PrefetchScalarGridSpec(
            num_scalar_prefetch=0,
            grid=(num_tiles,),
            in_specs=[
                pl.BlockSpec((B_pad, H), lambda i: (0, 0), **resident),   # x
                pl.BlockSpec((H, H4), lambda i: (0, 0), **resident),      # w1
                pl.BlockSpec((1, H4), lambda i: (0, 0), **resident),      # b1
                pl.BlockSpec((H4, TN), lambda i: (0, i)),                 # w2
                pl.BlockSpec((1, A_pad), lambda i: (0, 0), **resident),   # b2
            ],
            out_specs=pl.BlockSpec((B_pad, TN), lambda i: (0, i)),
        ),
        compiler_params=pltpu.CompilerParams(
            dimension_semantics=("parallel",),       # megacore-shardable
            vmem_limit_bytes=48 * 1024 * 1024),
        cost_estimate=cost,
    )(x, w1b, b1f, w2p, b2p)

    return out[:B, :A]


def init_params(key, hidden_size, num_answers):
    """Deterministic parameter init mirroring the module's shapes.
    PyTorch Linear weight is (out, in); kaiming_normal_ => std = sqrt(2/fan_in).
    We store weights transposed to (in, out) for the kernel."""
    k1, k2, k3, k4 = jax.random.split(key, 4)
    h4 = hidden_size * 4
    w1 = jax.random.normal(k1, (hidden_size, h4), jnp.float32) * jnp.sqrt(
        2.0 / hidden_size)
    b1 = jax.random.uniform(k2, (1, h4), jnp.float32,
                            -1.0 / jnp.sqrt(hidden_size),
                            1.0 / jnp.sqrt(hidden_size))
    w2 = jax.random.normal(k3, (h4, num_answers), jnp.float32) * jnp.sqrt(
        2.0 / h4)
    b2 = jax.random.uniform(k4, (1, num_answers), jnp.float32,
                            -1.0 / jnp.sqrt(h4), 1.0 / jnp.sqrt(h4))
    return w1, b1, w2, b2


if __name__ == "__main__":
    # Small shapes consistent with the module's forward:
    # fusion_feature: (batch=2, seq=8, hidden=32); num_answers=40.
    B, S, H, A = 2, 8, 32, 40
    key = jax.random.PRNGKey(0)
    k_x, k_p = jax.random.split(key)

    fusion_feature = jax.random.normal(k_x, (B, S, H), jnp.float32)
    w1, b1, w2, b2 = init_params(k_p, H, A)

    # One-time weight prep (cast + pad), then the cheap per-call forward.
    params = prepare_vqa_head_params(w1, b1, w2, b2)
    out = soho_vqa_head_forward(fusion_feature, params)
    out = jax.block_until_ready(out)

    # Pure-JAX reference using the same bf16 weights/activation + f32 accumulate.
    cls = fusion_feature[:, 0, :]
    h_ref = jnp.maximum(
        jnp.dot(cls.astype(jnp.bfloat16), w1.astype(jnp.bfloat16),
                preferred_element_type=jnp.float32) + b1, 0.0)
    ref = jnp.dot(h_ref.astype(jnp.bfloat16), w2.astype(jnp.bfloat16),
                  preferred_element_type=jnp.float32) + b2

    assert out.shape == (B, A)
    assert jnp.allclose(out, ref, atol=1e-2, rtol=1e-2)

    print("KERNEL_OK")
</pallas_src>

<mosaic_0001>
module attributes {stable_mosaic.version = 11 : i64} {
  func.func @_vqa_head_kernel(%arg0: i32, %arg1: memref<16x32xbf16, #tpu.memory_space<vmem>>, %arg2: memref<32x128xbf16, #tpu.memory_space<vmem>>, %arg3: memref<1x128xf32, #tpu.memory_space<vmem>>, %arg4: memref<128x128xbf16, #tpu.memory_space<vmem>>, %arg5: memref<1x128xf32, #tpu.memory_space<vmem>>, %arg6: memref<16x128xf32, #tpu.memory_space<vmem>>) attributes {dimension_semantics = [#tpu.dimension_semantics<parallel>], iteration_bounds = array<i64: 1>, scalar_prefetch = 0 : i64, scratch_operands = 0 : i64, tpu.core_type = #tpu.core_type<tc>, window_params = [{pipeline_mode = #tpu.pipeline_mode<synchronous>, transform_indices = @transform_0, window_bounds = array<i64: 16, 32>}, {pipeline_mode = #tpu.pipeline_mode<synchronous>, transform_indices = @transform_1, window_bounds = array<i64: 32, 128>}, {pipeline_mode = #tpu.pipeline_mode<synchronous>, transform_indices = @transform_2, window_bounds = array<i64: 1, 128>}, {transform_indices = @transform_3, window_bounds = array<i64: 128, 128>}, {pipeline_mode = #tpu.pipeline_mode<synchronous>, transform_indices = @transform_4, window_bounds = array<i64: 1, 128>}, {transform_indices = @transform_5, window_bounds = array<i64: 16, 128>}]} {
    %c0 = arith.constant 0 : index
    %c0_0 = arith.constant 0 : index
    %0 = vector.load %arg1[%c0, %c0_0] : memref<16x32xbf16, #tpu.memory_space<vmem>>, vector<16x32xbf16>
    %c0_1 = arith.constant 0 : index
    %c0_2 = arith.constant 0 : index
    %1 = vector.load %arg2[%c0_1, %c0_2] : memref<32x128xbf16, #tpu.memory_space<vmem>>, vector<32x128xbf16>
    %cst = arith.constant dense<0.000000e+00> : vector<16x128xf32>
    %2 = tpu.matmul %0, %1, %cst {dimension_numbers = #tpu.dot_dimension_numbers<[1], [0], [0], [1], [0, 0, 1, 1], [], []>} : vector<16x32xbf16>, vector<32x128xbf16>, vector<16x128xf32> -> vector<16x128xf32>
    %c0_3 = arith.constant 0 : index
    %c0_4 = arith.constant 0 : index
    %3 = vector.load %arg3[%c0_3, %c0_4] : memref<1x128xf32, #tpu.memory_space<vmem>>, vector<1x128xf32>
    %4 = vector.broadcast %3 : vector<1x128xf32> to vector<16x128xf32>
    %5 = arith.addf %2, %4 : vector<16x128xf32>
    %cst_5 = arith.constant 0.000000e+00 : f32
    %6 = vector.broadcast %cst_5 : f32 to vector<16x128xf32>
    %7 = arith.maximumf %5, %6 : vector<16x128xf32>
    %c128_i32 = arith.constant 128 : i32
    %8 = arith.muli %arg0, %c128_i32 : i32
    %9 = tpu.assume_multiple %8, 128 : i32
    %c0_6 = arith.constant 0 : index
    %10 = arith.index_cast %9 : i32 to index
    %11 = vector.load %arg5[%c0_6, %10] : memref<1x128xf32, #tpu.memory_space<vmem>>, vector<1x128xf32>
    %12 = arith.truncf %7 : vector<16x128xf32> to vector<16x128xbf16>
    %c0_7 = arith.constant 0 : index
    %c0_8 = arith.constant 0 : index
    %13 = vector.load %arg4[%c0_7, %c0_8] : memref<128x128xbf16, #tpu.memory_space<vmem>>, vector<128x128xbf16>
    %cst_9 = arith.constant dense<0.000000e+00> : vector<16x128xf32>
    %14 = tpu.matmul %12, %13, %cst_9 {dimension_numbers = #tpu.dot_dimension_numbers<[1], [0], [0], [1], [0, 0, 1, 1], [], []>} : vector<16x128xbf16>, vector<128x128xbf16>, vector<16x128xf32> -> vector<16x128xf32>
    %15 = vector.broadcast %11 : vector<1x128xf32> to vector<16x128xf32>
    %16 = arith.addf %14, %15 : vector<16x128xf32>
    %c0_10 = arith.constant 0 : index
    %c0_11 = arith.constant 0 : index
    %17 = vector.load %arg6[%c0_10, %c0_11] : memref<16x128xf32, #tpu.memory_space<vmem>>, vector<16x128xf32>
    tpu.vector_store %arg6[%c0_10, %c0_11], %16 {strides = array<i32>} : memref<16x128xf32, #tpu.memory_space<vmem>>, vector<16x128xf32>,
    return
  }
  func.func @transform_0(%arg0: i32) -> (i32, i32) {
    %c0_i32 = arith.constant 0 : i32
    %c0_i32_0 = arith.constant 0 : i32
    %c0_i32_1 = arith.constant 0 : i32
    return %c0_i32, %c0_i32_0 : i32, i32
  }
  func.func @transform_1(%arg0: i32) -> (i32, i32) {
    %c0_i32 = arith.constant 0 : i32
    %c0_i32_0 = arith.constant 0 : i32
    %c0_i32_1 = arith.constant 0 : i32
    return %c0_i32, %c0_i32_0 : i32, i32
  }
  func.func @transform_2(%arg0: i32) -> (i32, i32) {
    %c0_i32 = arith.constant 0 : i32
    %c0_i32_0 = arith.constant 0 : i32
    %c0_i32_1 = arith.constant 0 : i32
    return %c0_i32, %c0_i32_0 : i32, i32
  }
  func.func @transform_3(%arg0: i32) -> (i32, i32) {
    %c0_i32 = arith.constant 0 : i32
    %c0_i32_0 = arith.constant 0 : i32
    return %c0_i32, %arg0 : i32, i32
  }
  func.func @transform_4(%arg0: i32) -> (i32, i32) {
    %c0_i32 = arith.constant 0 : i32
    %c0_i32_0 = arith.constant 0 : i32
    %c0_i32_1 = arith.constant 0 : i32
    return %c0_i32, %c0_i32_0 : i32, i32
  }
  func.func @transform_5(%arg0: i32) -> (i32, i32) {
    %c0_i32 = arith.constant 0 : i32
    %c0_i32_0 = arith.constant 0 : i32
    return %c0_i32, %arg0 : i32, i32
  }
}

</mosaic_0001>

<bundles_post_ra>
// kernel: tpu_custom_call.1
= control target key start
LH: loop header
LB: loop body
LE: loop exit
PB: predicated region body
PF: predicated region fallthrough
CT: control target
= control target key end

     0   :  { %10 = vsyncpa [#allocation3], 0  ;;  %s557_s0 = inlined_call_operand.hbm [shape: bf16[16,32], index: 0, kind: input, shape index: {}]   ;;  %s558_s1 = inlined_call_operand.hbm [shape: bf16[32,128], index: 1, kind: input, shape index: {}]   ;;  %s559_s2 = inlined_call_operand.vmem [shape: f32[1,128], index: 2, kind: input, shape index: {}]   ;;  %s560_s3 = inlined_call_operand.hbm [shape: bf16[128,128], index: 3, kind: input, shape index: {}]   ;;  %s561_s4 = inlined_call_operand.vmem [shape: f32[1,128], index: 4, kind: input, shape index: {}]   ;;  %s562_s5 = inlined_call_operand.hbm [shape: f32[16,128], index: 5, kind: output, shape index: {}]  }
   0x1   :  { %11 = vsyncpa [#allocation6], 0 }
   0x2   :  { %12 = vsyncpa [#allocation4], 0  ;;  %s447_s18 = smov [#allocation5]   ;;  %s448_s20 = smov [#allocation2]  }
   0x3   :  { %s30_s19 = sshll.u32 %s447_s18, 4  ;;  %s18_s21 = sshll.u32 %s448_s20, 4  ;;  %s31_s19 = int_to_ptr.vmem [resolvable:$true] %s30_s19  ;;  %s487_s21 = int_to_ptr.vmem [resolvable:$true] %s18_s21 }
   0x4   :  { %s353_s24 = scalar_lea.hbm %s558_s1, 256 }
   0x5   :  { %p354_p0 = scmp.ne.s32.totalorder %s558_s1, %s353_s24  ;;  %p357_p1 = scmp.lt.u32.totalorder %s353_s24, %s558_s1 }
   0x7   :  { %p359_p2 = pnand %p357_p1, %p354_p0 }
   0x9   :  { %362 = shalt.err (!%p359_p2)
}
   0xa   :  { %s363_s29 = scalar_lea.vmem %s31_s19, 256  ;;  %p368_p4 = scmp.lt.s32.totalorder %s31_s19, %s31_s19 }
   0xb   :  { %p364_p3 = scmp.ne.s32.totalorder %s31_s19, %s363_s29  ;;  %p369_p5 = scmp.lt.s32.totalorder %s363_s29, %s363_s29 }
   0xd   :  { %p370_p6 = por %p369_p5, %p368_p4 }
   0xf   :  { %p371_p7 = pnand %p370_p6, %p364_p3 }
  0x11   :  { %374 = shalt.err (!%p371_p7)
}
  0x12   :  { %s449_s30 = smov 64   ;;  %s450_s6 = smov 4  }
  0x13   :  { %36 = dma.hbm_to_vmem [thread:$0]  %s558_s1, 256, %s31_s19, [#allocation6], %s449_s30, %s449_s30, %s450_s6  }
  0x14   :  { %s375_s11 = scalar_lea.hbm %s557_s0, 128 }
  0x15   :  { %p376_p8 = scmp.ne.s32.totalorder %s557_s0, %s375_s11  ;;  %p379_p9 = scmp.lt.u32.totalorder %s375_s11, %s557_s0 }
  0x17   :  { %p381_p10 = pnand %p379_p9, %p376_p8 }
  0x19   :  { %384 = shalt.err (!%p381_p10)
}
  0x1a   :  { %s385_s16 = scalar_lea.vmem %s487_s21, 128  ;;  %p390_p12 = scmp.lt.s32.totalorder %s487_s21, %s487_s21 }
  0x1b   :  { %p386_p11 = scmp.ne.s32.totalorder %s487_s21, %s385_s16  ;;  %p391_p13 = scmp.lt.s32.totalorder %s385_s16, %s385_s16 }
  0x1d   :  { %p392_p0 = por %p391_p13, %p390_p12 }
  0x1f   :  { %p393_p1 = pnand %p392_p0, %p386_p11 }
  0x21   :  { %396 = shalt.err (!%p393_p1)
}
  0x22   :  { %24 = dma.hbm_to_vmem [thread:$0]  %s557_s0, 128, %s487_s21, [#allocation3], %s449_s30, %s449_s30, %s450_s6  }
  0x23   :  { %s451_s18 = smov [#allocation7]   ;;  %s397_s23 = scalar_lea.hbm %s560_s3, 1024 }
  0x24   :  { %s44_s19 = sshll.u32 %s451_s18, 4  ;;  %p398_p2 = scmp.ne.s32.totalorder %s560_s3, %s397_s23  ;;  %s45_s19 = int_to_ptr.vmem [resolvable:$true] %s44_s19 }
  0x25   :  { %p401_p3 = scmp.lt.u32.totalorder %s397_s23, %s560_s3 }
  0x27   :  { %p403_p4 = pnand %p401_p3, %p398_p2 }
  0x29   :  { %406 = shalt.err (!%p403_p4)
}
  0x2a   :  { %s407_s28 = scalar_lea.vmem %s45_s19, 1024  ;;  %p412_p6 = scmp.lt.s32.totalorder %s45_s19, %s45_s19 }
  0x2b   :  { %p408_p5 = scmp.ne.s32.totalorder %s45_s19, %s407_s28  ;;  %p413_p7 = scmp.lt.s32.totalorder %s407_s28, %s407_s28 }
  0x2d   :  { %p414_p8 = por %p413_p7, %p412_p6 }
  0x2f   :  { %p415_p9 = pnand %p414_p8, %p408_p5 }
  0x31   :  { %418 = shalt.err (!%p415_p9)
}
  0x32   :  { %50 = dma.hbm_to_vmem [thread:$0]  %s560_s3, 1024, %s45_s19, [#allocation6], %s449_s30, %s449_s30, %s450_s6  }
  0x33   :  { %441 = dma.done.wait [#allocation3], 128  }
  0x34   :  { %442 = vsyncadd [#allocation3], 4294967168 }
  0x35   :  { %443 = dma.done.wait [#allocation6], 1280  }
  0x36   :  { %444 = vsyncadd [#allocation6], 4294966016  ;;  %v452_v0 = vmov 0.0   ;;  %vm453_vm0 = vmmov 0   ;;  %v342_v1 = vld [vmem:[#allocation5] sm:$0xff]   ;;  %v343_v2 = vld [vmem:[#allocation5 + $0x8] sm:$0xff]  }
  0x37   :  { %304 = vmatprep.subr.bf16.mxu0 %v452_v0  ;;  %308 = vmatprep.mubr.msk.bf16.mxu0 %vm453_vm0, %v452_v0  ;;  %v345_v3 = vld [vmem:[#allocation7] sm:$0xff]   ;;  %v344_v4 = vld [vmem:[#allocation2] sm:$0xff]   ;;  %vm93_vm1 = vcmask 261120   ;;  %v347_v6 = vld [vmem:[#allocation7 + $0x10] sm:$0xff]   ;;  %s454_s7 = smov [#allocation8]  }
  0x38   :  { %312 = vmatprep.subr.bf16.mxu1 %v452_v0  ;;  %328 = vmatprep.mubr.msk.bf16.mxu1 %vm453_vm0, %v452_v0  ;;  %v346_v5 = vld [vmem:[#allocation7 + $0x8] sm:$0xff]   ;;  %v348_v7 = vld [vmem:[#allocation7 + $0x18] sm:$0xff]   ;;  %v349_v8 = vld [vmem:[#allocation7 + $0x20] sm:$0xff]   ;;  %s264_s8 = sshll.u32 %s454_s7, 4  ;;  %s265_s8 = int_to_ptr.vmem [resolvable:$true] %s264_s8 }
  0x39   :  { %305 = vmatpush3.bf16.msra.mxu0 %v342_v1  ;;  %313 = vmatpush3.bf16.msra.mxu1 %v345_v3  ;;  %v350_v9 = vld [vmem:[#allocation7 + $0x28] sm:$0xff]   ;;  %v351_v10 = vld [vmem:[#allocation7 + $0x30] sm:$0xff]   ;;  %v352_v11 = vld [vmem:[#allocation7 + $0x38] sm:$0xff]   ;;  %p424_p11 = scmp.lt.s32.totalorder %s265_s8, %s265_s8 }
  0x3a   :  { %306 = vmatprep.subr.bf16.mxu0 %v452_v0  ;;  %314 = vmatprep.subr.bf16.mxu1 %v452_v0  ;;  %v278_v12 = vld [vmem:[%s559_s2] ss:$0 sm:$0xff]  ;;  %s419_s2 = scalar_lea.vmem %s265_s8, 256 }
  0x3b   :  { %v283_v22 = vld [vmem:[%s561_s4] ss:$0 sm:$0xff]  ;;  %p420_p10 = scmp.ne.s32.totalorder %s265_s8, %s419_s2  ;;  %p425_p12 = scmp.lt.s32.totalorder %s419_s2, %s419_s2 }
  0x3d   :  { %307 = vmatpush3.bf16.msra.mxu0 %v343_v2  ;;  %315 = vmatpush3.bf16.msra.mxu1 %v346_v5  ;;  %p426_p13 = por %p425_p12, %p424_p11 }
  0x3e   :  { %316 = vmatprep.subr.bf16.mxu1 %v452_v0 }
  0x3f   :  { %p427_p0 = pnand %p426_p13, %p420_p10 }
  0x40   :  { %309 = vmatmul.mubr.msk.bf16.vlgmr.msra.gmra.mrb[0].mxu0 %vm93_vm1, %v344_v4 }
  0x41   :  { %317 = vmatpush3.bf16.msra.mxu1 %v347_v6 }
  0x42   :  { %318 = vmatprep.subr.bf16.mxu1 %v452_v0 }
  0x45   :  { %319 = vmatpush3.bf16.msra.mxu1 %v348_v7 }
  0x46   :  { %320 = vmatprep.subr.bf16.mxu1 %v452_v0 }
  0x49   :  { %321 = vmatpush3.bf16.msra.mxu1 %v349_v8 }
  0x4a   :  { %322 = vmatprep.subr.bf16.mxu1 %v452_v0 }
  0x4d   :  { %323 = vmatpush3.bf16.msra.mxu1 %v350_v9 }
  0x4e   :  { %324 = vmatprep.subr.bf16.mxu1 %v452_v0 }
  0x51   :  { %325 = vmatpush3.bf16.msra.mxu1 %v351_v10 }
  0x52   :  { %326 = vmatprep.subr.bf16.mxu1 %v452_v0 }
  0x55   :  { %327 = vmatpush3.bf16.msra.mxu1 %v352_v11 }
 0x113   :  { %v131_v13 = vpop.f32.mrb[0].mxu0 }
 0x114   :  { %v132_v14 = vadd.f32 %v278_v12, %v131_v13  ;;  %v310_v15 = vpop.f32.mrb[1].mxu0 }
 0x115   :  { %v134_v16 = vpop.f32.mrb[2].mxu0 }
 0x116   :  { %v135_v17 = vadd.f32 %v278_v12, %v134_v16  ;;  %v311_v18 = vpop.f32.mrb[3].mxu0  ;;  %v138_v19 = vmax.f32 %v132_v14, 0.0 }
 0x118   :  { %v139_v20 = vmax.f32 %v135_v17, 0.0 }
 0x11a   :  { %v145_v21 = vpack.c.bf16 %v139_v20, %v138_v19 }
 0x11c   :  { %329 = vmatmul.mubr.bf16.vlgmr.msra.gmra.mrb[0].mxu1 %v145_v21 }
 0x1ef   :  { %v250_v23 = vpop.f32.mrb[0].mxu1 }
 0x1f0   :  { %v251_v24 = vadd.f32 %v283_v22, %v250_v23  ;;  %v330_v25 = vpop.f32.mrb[1].mxu1 }
 0x1f1   :  { %v253_v26 = vpop.f32.mrb[2].mxu1 }
 0x1f2   :  { %257 = vst [vmem:[#allocation8] sm:$0xff] %v251_v24  ;;  %v254_v27 = vadd.f32 %v283_v22, %v253_v26  ;;  %v331_v28 = vpop.f32.mrb[3].mxu1 }
 0x1f4   :  { %258 = vst [vmem:[#allocation8 + $0x8] sm:$0xff] %v254_v27 }
 0x1f5   :  { %430 = shalt.err (!%p427_p0)
}
 0x1f6   :  { %s431_s10 = scalar_lea.hbm %s562_s5, 256 }
 0x1f7   :  { %p432_p1 = scmp.ne.s32.totalorder %s562_s5, %s431_s10  ;;  %p435_p2 = scmp.lt.u32.totalorder %s431_s10, %s562_s5 }
 0x1f9   :  { %p437_p3 = pnand %p435_p2, %p432_p1 }
 0x1fb   :  { %440 = shalt.err (!%p437_p3)
}
 0x1fc   :  { %s455_s15 = smov 128   ;;  %s456_s16 = smov 8  }
 0x1fd   :  { %270 = dma.vmem_to_hbm [thread:$0]  %s265_s8, 256, %s562_s5, [#allocation4], %s455_s15, %s455_s15, %s456_s16  }
 0x1fe   :  { %445 = dma.done.wait [#allocation4], 256  }
 0x1ff   :  { %446 = vsyncadd [#allocation4], 4294967040 }
 0x200   :  { %274 = vsyncpa [#allocation3], 1 }
 0x201   :  { %275 = vsyncpa [#allocation6], 1 }
 0x202   :  { %276 = vsyncpa [#allocation4], 1 }

</bundles_post_ra>
